<compile_context>
chip_gen: v5e
topology: v5e:2x2
jax: 0.10.0
libtpu: 0.0.40
codegen_flags: <defaults>
</compile_context>

<pallas_src>
import functools

import jax
import jax.numpy as jnp
from jax import lax
from jax.experimental import pallas as pl
from jax.experimental.pallas import tpu as pltpu

NUM_ACTIVATIONS = 3  # [relu, tanh, sigmoid]


def _round_up(x, m):
    return (x + m - 1) // m * m


def _vmem_budget_and_limit():
    """(working-set budget, vmem_limit_bytes) derived from the TPU generation."""
    try:
        info = pltpu.get_tpu_info()
        cap = int(getattr(info, "vmem_capacity_bytes", 128 * 1024 * 1024))
    except Exception:
        cap = 128 * 1024 * 1024
    if cap <= 64 * 1024 * 1024:
        # v7x: 64 MiB per TensorCore -> leave ~16+ MiB headroom for compiler scratch.
        return 40 * 1024 * 1024, 56 * 1024 * 1024
    # v5e / v6e: 128 MiB physical VMEM.
    return 96 * 1024 * 1024, 112 * 1024 * 1024


def _select_tiles(B_pad, N128, K128, budget):
    """Pick (tn, tk): tk = full K first (collapses K grid, x fetched once),
    largest lane-dense tn that fits; keep >= 2 N tiles when N allows (megacore)."""

    def fits(tn, tk):
        x_b = 2 * B_pad * tk * 2        # bf16 x strip, double-buffered
        w_b = 2 * tn * tk * 2           # bf16 W tile, double-buffered
        bias_b = 2 * tn * 4             # f32 bias row, double-buffered
        o_b = 2 * B_pad * tn * 4        # f32 output/accumulator, double-buffered
        return x_b + w_b + bias_b + o_b <= budget

    if N128 >= 256:
        tn_top = max(128, (N128 // 2) // 128 * 128)   # >= 2 N tiles for 2 TCs
    else:
        tn_top = N128
    tn_cands = sorted(
        {t for t in (tn_top, 1024, 768, 512, 384, 256, 128) if t <= tn_top},
        reverse=True) or [128]

    tk_cands = [K128]
    t = K128
    while t > 128:
        t = max(128, (t // 2) // 128 * 128)
        if t != tk_cands[-1]:
            tk_cands.append(t)

    for tk in tk_cands:            # prefer collapsing the K grid first
        for tn in tn_cands:        # then the largest output tile
            if fits(tn, tk):
                return tn, tk
    # TODO(synk): very large B -> even the smallest tile exceeds the budget;
    # needs the two-pass restructure described above.
    return 128, 128


def polymorphic_neuron_kernel(x_ref, w_ref, b_ref, o_ref, *,
                              batch, batch_padded, num_activations):
    """Grid = (N tiles, K tiles).  x:(Bp,tk) bf16, w:(tn,tk) bf16, b:(1,tn) f32,
    o:(Bp,tn) f32 — o_ref doubles as the K-axis accumulator."""
    k = pl.program_id(1)

    @pl.when(k == 0)
    def _():
        o_ref[...] = jnp.zeros_like(o_ref)

    # (Bp, tk) x (tn, tk) contracted over K -> (Bp, tn); bf16 in, f32 accumulate.
    o_ref[...] += lax.dot_general(
        x_ref[...], w_ref[...],
        dimension_numbers=(((1,), (1,)), ((), ())),
        preferred_element_type=jnp.float32,
    )

    @pl.when(k == pl.num_programs(1) - 1)
    def _():
        y = o_ref[...] + b_ref[...]                          # (Bp, tn) f32

        # Per-column criterion: mean over the *real* batch rows only.
        if batch == batch_padded:
            col_sum = jnp.sum(y, axis=0, keepdims=True)
        else:
            row_ids = lax.broadcasted_iota(jnp.int32, y.shape, 0)
            col_sum = jnp.sum(jnp.where(row_ids < batch, y, 0.0),
                              axis=0, keepdims=True)
        crit = col_sum * (1.0 / batch)                       # (1, tn)

        # activation_idx = int(crit % num_activations); floor-mod is
        # non-negative, clamp guards the crit ~= k*num_activations edge case.
        idx = jnp.minimum(
            jnp.floor(jnp.mod(crit, float(num_activations))).astype(jnp.int32),
            num_activations - 1)
        is_relu = idx == 0                                   # (1, tn) masks
        is_tanh = idx == 1

        # Single EUP transcendental per element:
        #   sigmoid(y) = 0.5 * (1 + tanh(0.5 * y))
        t = jnp.tanh(jnp.where(is_tanh, y, 0.5 * y))
        out = jnp.where(is_relu, jnp.maximum(y, 0.0),
                        jnp.where(is_tanh, t, 0.5 * t + 0.5))
        o_ref[...] = out.astype(o_ref.dtype)


def polymorphic_neuron_layer(x, weights, bias, *, tn=None, tk=None):
    """x: (B, in_features); weights: (out_features, in_features); bias: (out_features,)."""
    B, K = x.shape
    N, K2 = weights.shape
    assert K == K2, "weight / input feature mismatch"

    B_pad = _round_up(max(B, 1), 16)      # bf16 x tile: (16, 128) sublane packing
    N128 = _round_up(N, 128)
    K128 = _round_up(K, 128)

    budget, vmem_limit = _vmem_budget_and_limit()
    if tn is None or tk is None:
        tn_sel, tk_sel = _select_tiles(B_pad, N128, K128, budget)
        tn = tn or tn_sel
        tk = tk or tk_sel

    N_pad = _round_up(N128, tn)
    K_pad = _round_up(K128, tk)

    # Pad + cast (bf16 MXU operands, f32 bias).  Zero padding is exact for the
    # matmul.  NOTE: for static weights, hoist/cache w_p and b_p across calls —
    # jnp.pad + astype is a separate HBM pass otherwise.
    x_p = jnp.pad(x.astype(jnp.bfloat16), ((0, B_pad - B), (0, K_pad - K)))
    w_p = jnp.pad(weights.astype(jnp.bfloat16), ((0, N_pad - N), (0, K_pad - K)))
    b_p = jnp.pad(bias.astype(jnp.float32).reshape(1, N), ((0, 0), (0, N_pad - N)))

    grid = (N_pad // tn, K_pad // tk)
    kernel = functools.partial(
        polymorphic_neuron_kernel,
        batch=B, batch_padded=B_pad, num_activations=NUM_ACTIVATIONS)

    cost = pl.CostEstimate(
        flops=2 * B * N * K,
        transcendentals=B * N,
        bytes_accessed=(B * K + N * K) * 2 + N * 4 + B * N * 4,
    )

    out = pl.pallas_call(
        kernel,
        out_shape=jax.ShapeDtypeStruct((B_pad, N_pad), jnp.float32),
        grid_spec=pltpu.PrefetchScalarGridSpec(
            num_scalar_prefetch=0,
            grid=grid,
            in_specs=[
                pl.BlockSpec((B_pad, tk), lambda n, k: (0, k)),   # x strip
                pl.BlockSpec((tn, tk),    lambda n, k: (n, k)),   # W (native N,K)
                pl.BlockSpec((1, tn),     lambda n, k: (0, n)),   # bias
            ],
            out_specs=pl.BlockSpec((B_pad, tn), lambda n, k: (0, n)),
        ),
        compiler_params=pltpu.CompilerParams(
            dimension_semantics=("parallel", "arbitrary"),
            vmem_limit_bytes=vmem_limit,
        ),
        cost_estimate=cost,
    )(x_p, w_p, b_p)

    return out[:B, :N]


def _reference(x, weights, bias):
    """Pure-JAX reference mirroring the PyTorch loop (same bf16 matmul precision)."""
    y = jnp.dot(x.astype(jnp.bfloat16), weights.astype(jnp.bfloat16).T,
                preferred_element_type=jnp.float32) + bias.astype(jnp.float32)
    crit = jnp.mean(y, axis=0)                                  # (N,)
    idx = jnp.floor(jnp.mod(crit, float(NUM_ACTIVATIONS))).astype(jnp.int32)
    relu = jnp.maximum(y, 0.0)
    tanh = jnp.tanh(y)
    sig = jax.nn.sigmoid(y)
    return jnp.where(idx[None, :] == 0, relu,
                     jnp.where(idx[None, :] == 1, tanh, sig))


if __name__ == "__main__":
    key = jax.random.PRNGKey(0)
    k_x, k_w, k_b = jax.random.split(key, 3)

    batch = 2
    in_features = 32
    out_features = 16

    x = jax.random.normal(k_x, (batch, in_features), dtype=jnp.float32)
    weights = jax.random.normal(k_w, (out_features, in_features), dtype=jnp.float32)
    bias = jax.random.normal(k_b, (out_features,), dtype=jnp.float32)

    out = polymorphic_neuron_layer(x, weights, bias)
    out = jax.block_until_ready(out)

    ref = _reference(x, weights, bias)
    assert out.shape == (batch, out_features)
    assert jnp.allclose(out, ref, atol=1e-5, rtol=1e-5), "mismatch vs reference"

    print("KERNEL_OK")
</pallas_src>

<mosaic_0001>
module attributes {stable_mosaic.version = 11 : i64} {
  func.func @polymorphic_neuron_kernel(%arg0: i32, %arg1: i32, %arg2: memref<16x128xbf16, #tpu.memory_space<vmem>>, %arg3: memref<128x128xbf16, #tpu.memory_space<vmem>>, %arg4: memref<1x128xf32, #tpu.memory_space<vmem>>, %arg5: memref<16x128xf32, #tpu.memory_space<vmem>>) attributes {dimension_semantics = [#tpu.dimension_semantics<parallel>, #tpu.dimension_semantics<arbitrary>], iteration_bounds = array<i64: 1, 1>, scalar_prefetch = 0 : i64, scratch_operands = 0 : i64, tpu.core_type = #tpu.core_type<tc>, window_params = [{transform_indices = @transform_0, window_bounds = array<i64: 16, 128>}, {transform_indices = @transform_1, window_bounds = array<i64: 128, 128>}, {transform_indices = @transform_2, window_bounds = array<i64: 1, 128>}, {transform_indices = @transform_3, window_bounds = array<i64: 16, 128>}]} {
    %c0_i32 = arith.constant 0 : i32
    %0 = arith.cmpi eq, %arg1, %c0_i32 : i32
    %1 = arith.extui %0 : i1 to i32
    %c0_i32_0 = arith.constant 0 : i32
    %2 = arith.cmpi ne, %1, %c0_i32_0 : i32
    scf.if %2 {
      %cst_10 = arith.constant 0.000000e+00 : f32
      %12 = vector.broadcast %cst_10 : f32 to vector<16x128xf32>
      %c0_11 = arith.constant 0 : index
      %c0_12 = arith.constant 0 : index
      %13 = vector.load %arg5[%c0_11, %c0_12] : memref<16x128xf32, #tpu.memory_space<vmem>>, vector<16x128xf32>
      tpu.vector_store %arg5[%c0_11, %c0_12], %12 {strides = array<i32>} : memref<16x128xf32, #tpu.memory_space<vmem>>, vector<16x128xf32>,
    } else {
    }
    %c0 = arith.constant 0 : index
    %c0_1 = arith.constant 0 : index
    %3 = vector.load %arg5[%c0, %c0_1] : memref<16x128xf32, #tpu.memory_space<vmem>>, vector<16x128xf32>
    %c0_2 = arith.constant 0 : index
    %c0_3 = arith.constant 0 : index
    %4 = vector.load %arg2[%c0_2, %c0_3] : memref<16x128xbf16, #tpu.memory_space<vmem>>, vector<16x128xbf16>
    %c0_4 = arith.constant 0 : index
    %c0_5 = arith.constant 0 : index
    %5 = vector.load %arg3[%c0_4, %c0_5] : memref<128x128xbf16, #tpu.memory_space<vmem>>, vector<128x128xbf16>
    %cst = arith.constant dense<0.000000e+00> : vector<16x128xf32>
    %6 = tpu.matmul %4, %5, %cst {dimension_numbers = #tpu.dot_dimension_numbers<[1], [1], [0], [0], [0, 0, 1, 0], [], []>} : vector<16x128xbf16>, vector<128x128xbf16>, vector<16x128xf32> -> vector<16x128xf32>
    %7 = arith.addf %3, %6 : vector<16x128xf32>
    %c0_6 = arith.constant 0 : index
    %c0_7 = arith.constant 0 : index
    %8 = vector.load %arg5[%c0_6, %c0_7] : memref<16x128xf32, #tpu.memory_space<vmem>>, vector<16x128xf32>
    tpu.vector_store %arg5[%c0_6, %c0_7], %7 {strides = array<i32>} : memref<16x128xf32, #tpu.memory_space<vmem>>, vector<16x128xf32>,
    %c0_i32_8 = arith.constant 0 : i32
    %9 = arith.cmpi eq, %arg1, %c0_i32_8 : i32
    %10 = arith.extui %9 : i1 to i32
    %c0_i32_9 = arith.constant 0 : i32
    %11 = arith.cmpi ne, %10, %c0_i32_9 : i32
    scf.if %11 {
      %c0_10 = arith.constant 0 : index
      %c0_11 = arith.constant 0 : index
      %12 = vector.load %arg5[%c0_10, %c0_11] : memref<16x128xf32, #tpu.memory_space<vmem>>, vector<16x128xf32>
      %c0_12 = arith.constant 0 : index
      %c0_13 = arith.constant 0 : index
      %13 = vector.load %arg4[%c0_12, %c0_13] : memref<1x128xf32, #tpu.memory_space<vmem>>, vector<1x128xf32>
      %14 = vector.broadcast %13 : vector<1x128xf32> to vector<16x128xf32>
      %15 = arith.addf %12, %14 : vector<16x128xf32>
      %16 = tpu.iota {dimensions = array<i32: 0>} : vector<16x128xi32>
      %c2_i32 = arith.constant 2 : i32
      %17 = vector.broadcast %c2_i32 : i32 to vector<16x128xi32>
      %18 = arith.cmpi slt, %16, %17 : vector<16x128xi32>
      %cst_14 = arith.constant 0.000000e+00 : f32
      %19 = vector.broadcast %cst_14 : f32 to vector<16x128xf32>
      %20 = arith.select %18, %15, %19 : vector<16x128xi1>, vector<16x128xf32>
      %cst_15 = arith.constant dense<0.000000e+00> : vector<128xf32>
      %21 = vector.multi_reduction <add>, %20, %cst_15 [0] : vector<16x128xf32> to vector<128xf32>
      %22 = vector.shape_cast %21 : vector<128xf32> to vector<1x128xf32>
      %cst_16 = arith.constant 5.000000e-01 : f32
      %23 = vector.broadcast %cst_16 : f32 to vector<1x128xf32>
      %24 = arith.mulf %22, %23 : vector<1x128xf32>
      %cst_17 = arith.constant 3.000000e+00 : f32
      %25 = vector.broadcast %cst_17 : f32 to vector<1x128xf32>
      %26 = arith.remf %24, %25 : vector<1x128xf32>
      %cst_18 = arith.constant 0.000000e+00 : f32
      %27 = vector.broadcast %cst_18 : f32 to vector<1x128xf32>
      %28 = arith.cmpf one, %26, %27 : vector<1x128xf32>
      %cst_19 = arith.constant 0.000000e+00 : f32
      %29 = vector.broadcast %cst_19 : f32 to vector<1x128xf32>
      %30 = arith.cmpf olt, %26, %29 : vector<1x128xf32>
      %cst_20 = arith.constant 0.000000e+00 : f32
      %31 = arith.cmpf olt, %cst_17, %cst_20 : f32
      %32 = vector.broadcast %31 : i1 to vector<1x128xi1>
      %33 = vector.broadcast %32 : vector<1x128xi1> to vector<1x128xi1>
      %34 = arith.xori %30, %33 : vector<1x128xi1>
      %35 = arith.andi %34, %28 : vector<1x128xi1>
      %36 = vector.broadcast %cst_17 : f32 to vector<1x128xf32>
      %37 = arith.addf %26, %36 : vector<1x128xf32>
      %38 = arith.select %35, %37, %26 : vector<1x128xi1>, vector<1x128xf32>
      %39 = math.floor %38 : vector<1x128xf32>
      %40 = arith.fptosi %39 : vector<1x128xf32> to vector<1x128xi32>
      %c2_i32_21 = arith.constant 2 : i32
      %41 = vector.broadcast %c2_i32_21 : i32 to vector<1x128xi32>
      %42 = arith.minsi %40, %41 : vector<1x128xi32>
      %c0_i32_22 = arith.constant 0 : i32
      %43 = vector.broadcast %c0_i32_22 : i32 to vector<1x128xi32>
      %44 = arith.cmpi eq, %42, %43 : vector<1x128xi32>
      %c1_i32 = arith.constant 1 : i32
      %45 = vector.broadcast %c1_i32 : i32 to vector<1x128xi32>
      %46 = arith.cmpi eq, %42, %45 : vector<1x128xi32>
      %cst_23 = arith.constant 5.000000e-01 : f32
      %47 = vector.broadcast %cst_23 : f32 to vector<16x128xf32>
      %48 = arith.mulf %47, %15 : vector<16x128xf32>
      %49 = vector.shape_cast %46 : vector<1x128xi1> to vector<1x128xi1>
      %50 = vector.broadcast %49 : vector<1x128xi1> to vector<16x128xi1>
      %51 = arith.select %50, %15, %48 : vector<16x128xi1>, vector<16x128xf32>
      %52 = math.tanh %51 : vector<16x128xf32>
      %cst_24 = arith.constant 0.000000e+00 : f32
      %53 = vector.broadcast %cst_24 : f32 to vector<16x128xf32>
      %54 = arith.maximumf %15, %53 : vector<16x128xf32>
      %cst_25 = arith.constant 5.000000e-01 : f32
      %55 = vector.broadcast %cst_25 : f32 to vector<16x128xf32>
      %56 = arith.mulf %55, %52 : vector<16x128xf32>
      %cst_26 = arith.constant 5.000000e-01 : f32
      %57 = vector.broadcast %cst_26 : f32 to vector<16x128xf32>
      %58 = arith.addf %56, %57 : vector<16x128xf32>
      %59 = vector.shape_cast %46 : vector<1x128xi1> to vector<1x128xi1>
      %60 = vector.broadcast %59 : vector<1x128xi1> to vector<16x128xi1>
      %61 = arith.select %60, %52, %58 : vector<16x128xi1>, vector<16x128xf32>
      %62 = vector.shape_cast %44 : vector<1x128xi1> to vector<1x128xi1>
      %63 = vector.broadcast %62 : vector<1x128xi1> to vector<16x128xi1>
      %64 = arith.select %63, %54, %61 : vector<16x128xi1>, vector<16x128xf32>
      %c0_27 = arith.constant 0 : index
      %c0_28 = arith.constant 0 : index
      %65 = vector.load %arg5[%c0_27, %c0_28] : memref<16x128xf32, #tpu.memory_space<vmem>>, vector<16x128xf32>
      tpu.vector_store %arg5[%c0_27, %c0_28], %64 {strides = array<i32>} : memref<16x128xf32, #tpu.memory_space<vmem>>, vector<16x128xf32>,
    } else {
    }
    return
  }
  func.func @transform_0(%arg0: i32, %arg1: i32) -> (i32, i32) {
    %c0_i32 = arith.constant 0 : i32
    %c0_i32_0 = arith.constant 0 : i32
    return %c0_i32, %arg1 : i32, i32
  }
  func.func @transform_1(%arg0: i32, %arg1: i32) -> (i32, i32) {
    %c0_i32 = arith.constant 0 : i32
    return %arg0, %arg1 : i32, i32
  }
  func.func @transform_2(%arg0: i32, %arg1: i32) -> (i32, i32) {
    %c0_i32 = arith.constant 0 : i32
    %c0_i32_0 = arith.constant 0 : i32
    return %c0_i32, %arg0 : i32, i32
  }
  func.func @transform_3(%arg0: i32, %arg1: i32) -> (i32, i32) {
    %c0_i32 = arith.constant 0 : i32
    %c0_i32_0 = arith.constant 0 : i32
    return %c0_i32, %arg0 : i32, i32
  }
}

</mosaic_0001>

<bundles_post_ra>
// kernel: tpu_custom_call.1
= control target key start
LH: loop header
LB: loop body
LE: loop exit
PB: predicated region body
PF: predicated region fallthrough
CT: control target
= control target key end

     0   :  { %8 = vsyncpa [#allocation3], 0  ;;  %s426_s0 = inlined_call_operand.hbm [shape: bf16[16,128], index: 0, kind: input, shape index: {}]   ;;  %s427_s1 = inlined_call_operand.hbm [shape: bf16[128,128], index: 1, kind: input, shape index: {}]   ;;  %s428_s2 = inlined_call_operand.vmem [shape: f32[1,128], index: 2, kind: input, shape index: {}]   ;;  %s429_s3 = inlined_call_operand.hbm [shape: f32[16,128], index: 3, kind: output, shape index: {}]  }
   0x1   :  { %9 = vsyncpa [#allocation6], 0 }
   0x2   :  { %10 = vsyncpa [#allocation4], 0  ;;  %s15_s14 = sshll.u32 %s426_s0, 4  ;;  %s382_s15 = smov [#allocation2]   ;;  %s16_s14 = int_to_ptr.hbm [resolvable:$true] %s15_s14 }
   0x3   :  { %s17_s16 = sshll.u32 %s382_s15, 4  ;;  %s28_s19 = sshll.u32 %s427_s1, 4  ;;  %s18_s16 = int_to_ptr.vmem [resolvable:$true] %s17_s16  ;;  %s29_s19 = int_to_ptr.hbm [resolvable:$true] %s28_s19 }
   0x4   :  { %s383_s20 = smov 64   ;;  %s384_s21 = smov 4  }
   0x5   :  { %23 = dma.hbm_to_vmem [thread:$0]  %s16_s14, 128, %s18_s16, [#allocation3], %s383_s20, %s383_s20, %s384_s21  }
   0x6   :  { %s385_s22 = smov [#allocation5]  }
   0x7   :  { %s30_s23 = sshll.u32 %s385_s22, 4  ;;  %s31_s23 = int_to_ptr.vmem [resolvable:$true] %s30_s23 }
   0x8   :  { %36 = dma.hbm_to_vmem [thread:$0]  %s29_s19, 1024, %s31_s23, [#allocation6], %s383_s20, %s383_s20, %s384_s21  }
   0x9   :  { %376 = dma.done.wait [#allocation3], 128  }
   0xa   :  { %377 = vsyncadd [#allocation3], 4294967168 }
   0xb   :  { %378 = dma.done.wait [#allocation6], 1024  }
   0xc   :  { %379 = vsyncadd [#allocation6], 4294966272  ;;  %v285_v0 = vld [vmem:[#allocation5 + $0x38] sm:$0xff]  ;;  %v284_v1 = vld [vmem:[#allocation5 + $0x30] sm:$0xff]  ;;  %v156_v9 = vlaneseq  ;;  %v386_v10 = vmov 3.0   ;;  %s227_s27 = sshll.u32 %s429_s3, 4  ;;  %s228_s27 = int_to_ptr.hbm [resolvable:$true] %s227_s27 }
   0xd   :  { %127 = vmatpush.bf16.xpose.msra.mxu0 %v285_v0  ;;  %v283_v2 = vld [vmem:[#allocation5 + $0x28] sm:$0xff]  ;;  %v282_v3 = vld [vmem:[#allocation5 + $0x20] sm:$0xff]  ;;  %v281_v4 = vld [vmem:[#allocation5 + $0x18] sm:$0xff]  ;;  %298 = vrcp.f32 %v386_v10  ;;  %s388_s28 = smov 128   ;;  %s389_s29 = smov 8  }
   0xe   :  { %v280_v5 = vld [vmem:[#allocation5 + $0x10] sm:$0xff]  ;;  %v279_v6 = vld [vmem:[#allocation5 + $0x8] sm:$0xff]  ;;  %v278_v7 = vld [vmem:[#allocation5] sm:$0xff]  ;;  %v157_v11 = vshrl.u32 %v156_v9, 7 }
   0xf   :  { %v277_v8 = vld [vmem:[#allocation2] sm:$0xff] }
  0x10   :  { %v297_v12 = vld [vmem:[%s428_s2] ss:$0 sm:$0xff]  ;;  %vm159_vm0 = vcmp.lt.s32.totalorder %v157_v11, 2  ;;  %s387_s2 = smov [#allocation7]  }
  0x11   :  { %s225_s24 = sshll.u32 %s387_s2, 4  ;;  %s226_s24 = int_to_ptr.vmem [resolvable:$true] %s225_s24 }
  0x13   :  { %v299_v13 = vpop.eup %298 }
  0x14   :  { %v173_v16 = vmul.f32 3.0, %v299_v13  ;;  %vm177_vm1 = vweird.f32 %v299_v13 }
  0x15   :  { %128 = vmatpush.bf16.xpose.msra.mxu0 %v284_v1 }
  0x16   :  { %v174_v19 = vsub.f32 1.0, %v173_v16 }
  0x18   :  { %v175_v22 = vmul.f32 %v299_v13, %v174_v19 }
  0x1a   :  { %v176_v25 = vadd.f32 %v299_v13, %v175_v22 }
  0x1c   :  { %v178_v28 = vsel %vm177_vm1, %v299_v13, %v176_v25 }
  0x1d   :  { %129 = vmatpush.bf16.xpose.msra.mxu0 %v283_v2 }
  0x25   :  { %130 = vmatpush.bf16.xpose.msra.mxu0 %v282_v3 }
  0x2d   :  { %131 = vmatpush.bf16.xpose.msra.mxu0 %v281_v4 }
  0x35   :  { %132 = vmatpush.bf16.xpose.msra.mxu0 %v280_v5 }
  0x3d   :  { %133 = vmatpush.bf16.xpose.msra.mxu0 %v279_v6 }
  0x45   :  { %134 = vmatpush.bf16.xpose.msra.mxu0 %v278_v7 }
  0x4c   :  { %135 = vmatmul.bf16.vlgmr.msra.gmra.mxu0 %v277_v8 }
  0xc9   :  { %v136_v14 = vpop.f32.mrf.mxu0 }
  0xca   :  { %v154_v15 = vadd.f32 %v297_v12, %v136_v14 }
  0xcc   :  { %v161_v17 = vsel %vm159_vm0, %v154_v15, 0.0  ;;  %v199_v45 = vmul.f32 0.5, %v154_v15  ;;  %v207_v54 = vmax.f32 %v154_v15, 0.0 }
  0xcd   :  { %v164_v18 = vrot.slane %v161_v17, 4 }
  0xcf   :  { %v165_v20 = vadd.f32 %v164_v18, %v161_v17 }
  0xd1   :  { %v166_v21 = vrot.slane %v165_v20, 2  ;;  %v138_v37 = vpop.f32.mrf.mxu0 }
  0xd2   :  { %v155_v42 = vadd.f32 %v297_v12, %v138_v37 }
  0xd3   :  { %v167_v23 = vadd.f32 %v166_v21, %v165_v20 }
  0xd4   :  { %v200_v46 = vmul.f32 0.5, %v155_v42  ;;  %v208_v57 = vmax.f32 %v155_v42, 0.0 }
  0xd5   :  { %v168_v24 = vrot.slane %v167_v23, 1 }
  0xd7   :  { %v169_v26 = vadd.f32 %v168_v24, %v167_v23 }
  0xd9   :  { %v170_v27 = vmul.f32 0.5, %v169_v26 }
  0xdb   :  { %v171_v29 = vand.u32 2147483647, %v170_v27  ;;  %v186_v36 = vand.u32 2147483648, %v170_v27 }
  0xdd   :  { %v179_v30 = vmul.f32 %v178_v28, %v171_v29 }
  0xdf   :  { %v180_v31 = vfloor.f32 %v179_v30 }
  0xe1   :  { %v181_v32 = vmul.f32 3.0, %v180_v31 }
  0xe3   :  { %v182_v33 = vsub.f32 %v171_v29, %v181_v32 }
  0xe5   :  { %vm183_vm2 = vcmp.eq.f32.partialorder %v182_v33, 3.0 }
  0xe6   :  { %v184_v34 = vsel %vm183_vm2, 0.0, %v182_v33 }
  0xe7   :  { %v185_v35 = vand.u32 2147483647, %v184_v34 }
  0xe9   :  { %v187_v38 = vor.u32 %v186_v36, %v185_v35 }
  0xeb   :  { %vm188_vm3 = vcmp.ne.f32.partialorder %v187_v38, 0.0  ;;  %vm189_vm4 = vcmp.lt.f32.partialorder %v187_v38, 0.0  ;;  %v191_v39 = vadd.f32 3.0, %v187_v38 }
  0xec   :  { %vm190_vm5 = vmand %vm189_vm4, %vm188_vm3 }
  0xed   :  { %v192_v40 = vsel %vm190_vm5, %v191_v39, %v187_v38 }
  0xee   :  { %v193_v41 = vfloor.f32 %v192_v40 }
  0xf0   :  { %v287_v43 = vcvt.f32.s32 %v193_v41 }
  0xf2   :  { %vm195_vm6 = vcmp.lt.s32.totalorder %v287_v43, 2 }
  0xf3   :  { %v196_v44 = vsel %vm195_vm6, %v287_v43, 2 }
  0xf4   :  { %vm198_vm7 = vcmp.eq.s32.totalorder %v196_v44, 1  ;;  %vm197_vm8 = vcmp.eq.s32.totalorder %v196_v44, 0 }
  0xf5   :  { %v203_v47 = vsel %vm198_vm7, %v154_v15, %v199_v45  ;;  %v204_v48 = vsel %vm198_vm7, %v155_v42, %v200_v46 }
  0xf6   :  { %300 = vtanh.f32 %v203_v47 }
  0xf7   :  { %302 = vtanh.f32 %v204_v48 }
  0xfc   :  { %v301_v49 = vpop.eup %300 }
  0xfd   :  { %v303_v50 = vpop.eup %302  ;;  %v209_v51 = vmul.f32 0.5, %v301_v49 }
  0xfe   :  { %v210_v52 = vmul.f32 0.5, %v303_v50 }
  0xff   :  { %v211_v53 = vadd.f32 0.5, %v209_v51 }
 0x100   :  { %v212_v55 = vadd.f32 0.5, %v210_v52 }
 0x101   :  { %v213_v56 = vsel %vm198_vm7, %v301_v49, %v211_v53 }
 0x102   :  { %v217_v58 = vsel %vm197_vm8, %v207_v54, %v213_v56  ;;  %v214_v59 = vsel %vm198_vm7, %v303_v50, %v212_v55 }
 0x103   :  { %219 = vst [vmem:[#allocation7] sm:$0xff] %v217_v58  ;;  %v218_v60 = vsel %vm197_vm8, %v208_v57, %v214_v59 }
 0x104   :  { %220 = vst [vmem:[#allocation7 + $0x8] sm:$0xff] %v218_v60 }
 0x105   :  { %233 = dma.vmem_to_hbm [thread:$0]  %s226_s24, 256, %s228_s27, [#allocation4], %s388_s28, %s388_s28, %s389_s29  }
 0x106   :  { %380 = dma.done.wait [#allocation4], 256  }
 0x107   :  { %381 = vsyncadd [#allocation4], 4294967040 }
 0x108   :  { %238 = vsyncpa [#allocation3], 1 }
 0x109   :  { %239 = vsyncpa [#allocation6], 1 }
 0x10a   :  { %240 = vsyncpa [#allocation4], 1 }

</bundles_post_ra>
